<compile_context>
chip_gen: v5e
topology: v5e:2x2
jax: 0.10.0
libtpu: 0.0.40
codegen_flags: <defaults>
</compile_context>

<pallas_src>
import functools

import jax
import jax.numpy as jnp
import numpy as np
from jax.experimental import pallas as pl
from jax.experimental.pallas import tpu as pltpu

# Python / numpy scalar constants only (module-level jnp arrays get captured as
# jaxpr consts inside the kernel and pallas_call rejects them).
_NEG = -1e30          # finite "-inf" for masked logit lanes
_BIG = 1e30           # "+inf" for masked race lanes
_HASH_M1 = np.uint32(0x7FEB352D)   # lowbias32 hash constants
_HASH_M2 = np.uint32(0x846CA68B)
_GOLD = np.uint32(0x9E3779B9)


def _hash32(x):
    """Cheap integer mix (lowbias32) -> pseudo-random uint32 bits on the VPU."""
    x = (x ^ (x >> 16)) * _HASH_M1
    x = (x ^ (x >> 15)) * _HASH_M2
    return x ^ (x >> 16)


def _agent_kernel(seed_ref, obs_ref, w_enc_ref, b_enc_ref, w_head_ref,
                  b_head_ref, *rest, num_actions, sample):
    if sample:
        (out_ref,) = rest
        act_in_ref = None
    else:
        act_in_ref, out_ref = rest

    # ---- policy(obs, state): encoder + fused actor/critic head ----
    x = obs_ref[...].astype(jnp.bfloat16)          # in-kernel cast of raw f32 obs
    h = jnp.dot(x, w_enc_ref[...], preferred_element_type=jnp.float32)
    h = jnp.maximum(h + b_enc_ref[...], 0.0)       # (TB, H) f32 ReLU

    head = jnp.dot(h.astype(jnp.bfloat16), w_head_ref[...],
                   preferred_element_type=jnp.float32) + b_head_ref[...]  # (TB, A_pad)

    TB, A_pad = head.shape
    lane = jax.lax.broadcasted_iota(jnp.int32, (TB, A_pad), 1)
    valid = lane < num_actions

    value = head[:, num_actions:num_actions + 1]   # static column slice (TB, 1)
    logits = jnp.where(valid, head, _NEG)

    # ---- sample_logits: log-softmax, entropy, sample / evaluate, logprob ----
    m = jnp.max(logits, axis=-1, keepdims=True)
    z = logits - m
    ez = jnp.exp(z)                                # reused for entropy & sampling
    sumexp = jnp.sum(ez, axis=-1, keepdims=True)
    lse = jnp.log(sumexp)
    logp = z - lse                                 # log-softmax
    ezz = jnp.sum(jnp.where(valid, ez * z, 0.0), axis=-1, keepdims=True)
    entropy = lse - ezz / sumexp                   # == -sum(p * logp)

    if sample:
        # Exponential-race categorical sample (== Gumbel-max), reusing ez.
        # Noise bits come from a counter hash of the GLOBAL row index, so the
        # sample does not depend on tile_b or grid sharding.
        row = (jax.lax.broadcasted_iota(jnp.int32, (TB, A_pad), 0)
               + pl.program_id(0) * TB)
        ctr = (row * A_pad + lane).astype(jnp.uint32)
        seed_u = seed_ref[0].astype(jnp.uint32)
        bits = _hash32(ctr + seed_u * _GOLD)
        mant = (bits >> 9) | np.uint32(0x3F800000)               # [1, 2) mantissa trick
        u = jax.lax.bitcast_convert_type(mant, jnp.float32) - 1.0  # uniform [0, 1)
        e = -jnp.log(jnp.maximum(u, 1e-12))                       # Exp(1) noise
        race = jnp.where(valid, e / ez, _BIG)                     # argmin(E_i / exp(z_i))
        rmin = jnp.min(race, axis=-1, keepdims=True)
        act = jnp.min(jnp.where(race <= rmin, lane, A_pad),
                      axis=-1, keepdims=True)                     # (TB, 1) int32
    else:
        act = act_in_ref[...]                                     # (TB, 1) int32

    logprob_act = jnp.sum(jnp.where(lane == act, logp, 0.0),
                          axis=-1, keepdims=True)                 # (TB, 1)

    # Single lane-dense output tile:
    #   lanes [0, A)        -> log_softmax(logits)
    #   lane  A             -> action (as f32; exact for indices < 2^24)
    #   lanes A+1..A+3      -> logprob(action), entropy, value
    out = jnp.where(valid, logp, 0.0)              # padded lanes explicitly overwritten
    out = jnp.where(lane == num_actions, act.astype(jnp.float32), out)
    out = jnp.where(lane == num_actions + 1, logprob_act, out)
    out = jnp.where(lane == num_actions + 2, entropy, out)
    out = jnp.where(lane == num_actions + 3, value, out)
    out_ref[...] = out


def prepare_params(params):
    """One-time weight prep (per weight update), hoisted out of the per-step path:
    fuse actor + critic into one head (value = extra column) and cast to bf16."""
    w_enc = params["w_enc"]
    F, H = w_enc.shape
    A = params["w_act"].shape[1]
    A_pad = max(128, ((A + 4 + 127) // 128) * 128)   # room for 4 packed scalar lanes

    w_head = jnp.zeros((H, A_pad), jnp.float32)
    w_head = w_head.at[:, :A].set(params["w_act"]).at[:, A].set(params["w_val"][0])
    b_head = jnp.zeros((1, A_pad), jnp.float32)
    b_head = b_head.at[:, :A].set(params["b_act"]).at[:, A].set(params["b_val"][0])

    return {
        "w_enc": w_enc.astype(jnp.bfloat16),
        "b_enc": params["b_enc"].astype(jnp.float32),
        "w_head": w_head.astype(jnp.bfloat16),
        "b_head": b_head,
        "in_features": F,
        "hidden": H,
        "num_actions": A,
        "a_pad": A_pad,
    }


def puffer_agent_forward(prep, obs, seed, action=None, *, tile_b=None):
    """Returns (action, logprob_act, entropy, value, log_sftmx_logits)."""
    B = obs.shape[0]
    obs_flat = obs.reshape(B, -1)                    # torch .view(B, -1), row-major
    F = obs_flat.shape[1]
    H = prep["hidden"]
    A = prep["num_actions"]
    A_pad = prep["a_pad"]
    assert F == prep["in_features"]
    itemsize = obs_flat.dtype.itemsize

    # Batch tile: large (up to 256) but VMEM-budgeted so double-buffered obs +
    # resident weights + output fit v7x's 64 MiB VMEM (and v5e's 16 MiB scoped default).
    weights_bytes = 2 * (F * H + H * A_pad) * 2 + (H + A_pad) * 8
    per_row = 2 * F * itemsize + 2 * A_pad * 4 + 8 * A_pad * 4
    if tile_b is None:
        budget = 24 * 1024 * 1024
        tile_b = max(8, min(256, (budget - weights_bytes) // per_row))
    tile_b = min(tile_b, ((B + 7) // 8) * 8)         # small batch -> one whole-batch tile
    tile_b = max(8, (tile_b // 8) * 8)

    B_pad = ((B + tile_b - 1) // tile_b) * tile_b
    n_tiles = B_pad // tile_b

    # Feed obs directly (no wrapper-side cast/copy); only pad a ragged last tile.
    if B_pad != B:
        obs_flat = jnp.pad(obs_flat, ((0, B_pad - B), (0, 0)))

    sample = action is None
    seed_arr = jnp.asarray([seed], jnp.int32)

    const_map = lambda i, seed_ref: (0, 0)           # weights resident across batch tiles
    row_map = lambda i, seed_ref: (i, 0)

    # NOTE: weights could be single-buffered via pipeline_mode=pl.Buffered(1) to
    # halve their resident VMEM; left at default buffering for portability.
    # TODO(synk): for very large obs (F >> 10k) split F over a reduction grid
    # axis with a VMEM f32 accumulator instead of one (F, H) block.
    in_specs = [
        pl.BlockSpec((tile_b, F), row_map),
        pl.BlockSpec((F, H), const_map),
        pl.BlockSpec((1, H), const_map),
        pl.BlockSpec((H, A_pad), const_map),
        pl.BlockSpec((1, A_pad), const_map),
    ]
    inputs = [obs_flat, prep["w_enc"], prep["b_enc"], prep["w_head"], prep["b_head"]]
    if not sample:
        act_p = jnp.asarray(action).reshape(B, 1).astype(jnp.int32)
        if B_pad != B:
            act_p = jnp.pad(act_p, ((0, B_pad - B), (0, 0)))
        in_specs.append(pl.BlockSpec((tile_b, 1), row_map))
        inputs.append(act_p)

    vmem_est = (2 * tile_b * F * itemsize + weights_bytes
                + 2 * tile_b * A_pad * 4 + 8 * tile_b * A_pad * 4)
    vmem_limit = int(min(64 * 1024 * 1024, max(8 * 1024 * 1024, 2 * vmem_est)))

    kernel = functools.partial(_agent_kernel, num_actions=A, sample=sample)
    out = pl.pallas_call(
        kernel,
        out_shape=jax.ShapeDtypeStruct((B_pad, A_pad), jnp.float32),
        grid_spec=pltpu.PrefetchScalarGridSpec(
            num_scalar_prefetch=1,
            grid=(n_tiles,),
            in_specs=in_specs,
            out_specs=pl.BlockSpec((tile_b, A_pad), row_map),
        ),
        compiler_params=pltpu.CompilerParams(
            dimension_semantics=("parallel",),
            vmem_limit_bytes=vmem_limit),
    )(seed_arr, *inputs)

    action_out = out[:B, A].astype(jnp.int32)
    logprob = out[:B, A + 1]
    entropy = out[:B, A + 2]
    value = out[:B, A + 3]
    log_sftmx = out[:B, :A]
    return action_out, logprob, entropy, value, log_sftmx


def init_params(key, in_features, hidden, num_actions):
    k1, k2, k3 = jax.random.split(key, 3)
    scale_enc = 1.0 / jnp.sqrt(jnp.float32(in_features))
    scale_head = 1.0 / jnp.sqrt(jnp.float32(hidden))
    return {
        "w_enc": jax.random.normal(k1, (in_features, hidden), jnp.float32) * scale_enc,
        "b_enc": jnp.zeros((1, hidden), jnp.float32),
        "w_act": jax.random.normal(k2, (hidden, num_actions), jnp.float32) * scale_head,
        "b_act": jnp.zeros((1, num_actions), jnp.float32),
        "w_val": jax.random.normal(k3, (1, hidden), jnp.float32) * scale_head,
        "b_val": jnp.zeros((1, 1), jnp.float32),
    }


if __name__ == "__main__":
    # obs (B, C, H, W) = (16, 4, 16, 16); single whole-batch tile.
    B, C, H, W = 16, 4, 16, 16
    HID, A = 128, 16

    root = jax.random.PRNGKey(0)
    k_obs, k_param = jax.random.split(root, 2)

    obs = jax.random.normal(k_obs, (B, C, H, W), jnp.float32)
    params = init_params(k_param, C * H * W, HID, A)
    prep = prepare_params(params)   # one-time weight prep, out of the per-step hot path
    state = None  # TODO(synk): recurrent state (LSTMWrapper carry) not modeled; feed-forward policy.

    # --- sampling path (action=None) ---
    action, logprob, entropy, value, log_sftmx = puffer_agent_forward(
        prep, obs, seed=1234, action=None)
    jax.block_until_ready((action, logprob, entropy, value, log_sftmx))

    # --- pure-JAX reference with the same bf16-at-the-MXU policy math ---
    xb = obs.reshape(B, -1).astype(jnp.bfloat16)
    h_ref = jnp.maximum(
        jnp.dot(xb, params["w_enc"].astype(jnp.bfloat16),
                preferred_element_type=jnp.float32) + params["b_enc"], 0.0)
    hb = h_ref.astype(jnp.bfloat16)
    logits_ref = jnp.dot(hb, params["w_act"].astype(jnp.bfloat16),
                         preferred_element_type=jnp.float32) + params["b_act"]
    value_ref = (jnp.dot(hb, params["w_val"].astype(jnp.bfloat16).T,
                         preferred_element_type=jnp.float32) + params["b_val"])[:, 0]
    logp_ref = jax.nn.log_softmax(logits_ref, axis=-1)
    p_ref = jnp.exp(logp_ref)
    ent_ref = -jnp.sum(p_ref * logp_ref, axis=-1)

    assert action.shape == (B,) and action.dtype == jnp.int32
    assert bool(jnp.all((action >= 0) & (action < A)))
    assert logprob.shape == (B,) and entropy.shape == (B,) and value.shape == (B,)
    assert log_sftmx.shape == (B, A)
    assert jnp.allclose(log_sftmx, logp_ref, atol=2e-2, rtol=2e-2)
    assert jnp.allclose(value, value_ref, atol=2e-2, rtol=2e-2)
    assert jnp.allclose(entropy, ent_ref, atol=2e-2, rtol=2e-2)
    assert jnp.allclose(logprob, log_sftmx[jnp.arange(B), action], atol=1e-5)

    # --- evaluate-given-action path (trace-time specialized variant) ---
    a2, lp2, ent2, v2, ls2 = puffer_agent_forward(prep, obs, seed=0, action=action)
    jax.block_until_ready((a2, lp2, ent2, v2, ls2))
    assert bool(jnp.all(a2 == action))
    assert jnp.allclose(lp2, logprob, atol=1e-5)
    assert jnp.allclose(v2, value, atol=1e-5)

    print("KERNEL_OK")
</pallas_src>

<mosaic_0001>
module attributes {stable_mosaic.version = 11 : i64} {
  func.func @_agent_kernel(%arg0: i32, %arg1: memref<1xi32, #tpu.memory_space<smem>>, %arg2: memref<16x1024xf32, #tpu.memory_space<vmem>>, %arg3: memref<1024x128xbf16, #tpu.memory_space<vmem>>, %arg4: memref<1x128xf32, #tpu.memory_space<vmem>>, %arg5: memref<128x128xbf16, #tpu.memory_space<vmem>>, %arg6: memref<1x128xf32, #tpu.memory_space<vmem>>, %arg7: memref<16x128xf32, #tpu.memory_space<vmem>>) attributes {dimension_semantics = [#tpu.dimension_semantics<parallel>], iteration_bounds = array<i64: 1>, scalar_prefetch = 1 : i64, scratch_operands = 0 : i64, tpu.core_type = #tpu.core_type<tc>, window_params = [{transform_indices = @transform_0, window_bounds = array<i64: 16, 1024>}, {pipeline_mode = #tpu.pipeline_mode<synchronous>, transform_indices = @transform_1, window_bounds = array<i64: 1024, 128>}, {pipeline_mode = #tpu.pipeline_mode<synchronous>, transform_indices = @transform_2, window_bounds = array<i64: 1, 128>}, {pipeline_mode = #tpu.pipeline_mode<synchronous>, transform_indices = @transform_3, window_bounds = array<i64: 128, 128>}, {pipeline_mode = #tpu.pipeline_mode<synchronous>, transform_indices = @transform_4, window_bounds = array<i64: 1, 128>}, {transform_indices = @transform_5, window_bounds = array<i64: 16, 128>}]} {
    %c0 = arith.constant 0 : index
    %c0_0 = arith.constant 0 : index
    %0 = vector.load %arg2[%c0, %c0_0] : memref<16x1024xf32, #tpu.memory_space<vmem>>, vector<16x1024xf32>
    %1 = arith.truncf %0 : vector<16x1024xf32> to vector<16x1024xbf16>
    %c0_1 = arith.constant 0 : index
    %c0_2 = arith.constant 0 : index
    %2 = vector.load %arg3[%c0_1, %c0_2] : memref<1024x128xbf16, #tpu.memory_space<vmem>>, vector<1024x128xbf16>
    %cst = arith.constant dense<0.000000e+00> : vector<16x128xf32>
    %3 = tpu.matmul %1, %2, %cst {dimension_numbers = #tpu.dot_dimension_numbers<[1], [0], [0], [1], [0, 0, 1, 1], [], []>} : vector<16x1024xbf16>, vector<1024x128xbf16>, vector<16x128xf32> -> vector<16x128xf32>
    %c0_3 = arith.constant 0 : index
    %c0_4 = arith.constant 0 : index
    %4 = vector.load %arg4[%c0_3, %c0_4] : memref<1x128xf32, #tpu.memory_space<vmem>>, vector<1x128xf32>
    %5 = vector.broadcast %4 : vector<1x128xf32> to vector<16x128xf32>
    %6 = arith.addf %3, %5 : vector<16x128xf32>
    %cst_5 = arith.constant 0.000000e+00 : f32
    %7 = vector.broadcast %cst_5 : f32 to vector<16x128xf32>
    %8 = arith.maximumf %6, %7 : vector<16x128xf32>
    %9 = arith.truncf %8 : vector<16x128xf32> to vector<16x128xbf16>
    %c0_6 = arith.constant 0 : index
    %c0_7 = arith.constant 0 : index
    %10 = vector.load %arg5[%c0_6, %c0_7] : memref<128x128xbf16, #tpu.memory_space<vmem>>, vector<128x128xbf16>
    %cst_8 = arith.constant dense<0.000000e+00> : vector<16x128xf32>
    %11 = tpu.matmul %9, %10, %cst_8 {dimension_numbers = #tpu.dot_dimension_numbers<[1], [0], [0], [1], [0, 0, 1, 1], [], []>} : vector<16x128xbf16>, vector<128x128xbf16>, vector<16x128xf32> -> vector<16x128xf32>
    %c0_9 = arith.constant 0 : index
    %c0_10 = arith.constant 0 : index
    %12 = vector.load %arg6[%c0_9, %c0_10] : memref<1x128xf32, #tpu.memory_space<vmem>>, vector<1x128xf32>
    %13 = vector.broadcast %12 : vector<1x128xf32> to vector<16x128xf32>
    %14 = arith.addf %11, %13 : vector<16x128xf32>
    %15 = tpu.iota {dimensions = array<i32: 1>} : vector<16x128xi32>
    %c16_i32 = arith.constant 16 : i32
    %16 = vector.broadcast %c16_i32 : i32 to vector<16x128xi32>
    %17 = arith.cmpi slt, %15, %16 : vector<16x128xi32>
    %18 = vector.extract_strided_slice %14 {offsets = [0, 16], sizes = [16, 1], strides = [1, 1]} : vector<16x128xf32> to vector<16x1xf32>
    %cst_11 = arith.constant -1.000000e+30 : f32
    %19 = vector.broadcast %cst_11 : f32 to vector<16x128xf32>
    %20 = arith.select %17, %14, %19 : vector<16x128xi1>, vector<16x128xf32>
    %cst_12 = arith.constant dense<0xFF800000> : vector<16xf32>
    %21 = vector.multi_reduction <maximumf>, %20, %cst_12 [1] : vector<16x128xf32> to vector<16xf32>
    %22 = vector.shape_cast %21 : vector<16xf32> to vector<16x1xf32>
    %23 = vector.broadcast %22 : vector<16x1xf32> to vector<16x128xf32>
    %24 = arith.subf %20, %23 : vector<16x128xf32>
    %25 = math.exp %24 : vector<16x128xf32>
    %cst_13 = arith.constant dense<0.000000e+00> : vector<16xf32>
    %26 = vector.multi_reduction <add>, %25, %cst_13 [1] : vector<16x128xf32> to vector<16xf32>
    %27 = vector.shape_cast %26 : vector<16xf32> to vector<16x1xf32>
    %28 = math.log %27 : vector<16x1xf32>
    %29 = vector.broadcast %28 : vector<16x1xf32> to vector<16x128xf32>
    %30 = arith.subf %24, %29 : vector<16x128xf32>
    %31 = arith.mulf %25, %24 : vector<16x128xf32>
    %cst_14 = arith.constant 0.000000e+00 : f32
    %32 = vector.broadcast %cst_14 : f32 to vector<16x128xf32>
    %33 = arith.select %17, %31, %32 : vector<16x128xi1>, vector<16x128xf32>
    %cst_15 = arith.constant dense<0.000000e+00> : vector<16xf32>
    %34 = vector.multi_reduction <add>, %33, %cst_15 [1] : vector<16x128xf32> to vector<16xf32>
    %35 = vector.shape_cast %34 : vector<16xf32> to vector<16x1xf32>
    %36 = arith.divf %35, %27 : vector<16x1xf32>
    %37 = arith.subf %28, %36 : vector<16x1xf32>
    %38 = tpu.iota {dimensions = array<i32: 0>} : vector<16x128xi32>
    %c16_i32_16 = arith.constant 16 : i32
    %39 = arith.muli %arg0, %c16_i32_16 : i32
    %40 = vector.broadcast %39 : i32 to vector<16x128xi32>
    %41 = arith.addi %38, %40 : vector<16x128xi32>
    %c128_i32 = arith.constant 128 : i32
    %42 = vector.broadcast %c128_i32 : i32 to vector<16x128xi32>
    %43 = arith.muli %41, %42 : vector<16x128xi32>
    %44 = arith.addi %43, %15 : vector<16x128xi32>
    %c0_17 = arith.constant 0 : index
    %45 = memref.load %arg1[%c0_17] : memref<1xi32, #tpu.memory_space<smem>>
    %c-1640531527_i32 = arith.constant -1640531527 : i32
    %46 = arith.muli %45, %c-1640531527_i32 : i32
    %47 = vector.broadcast %46 : i32 to vector<16x128xi32>
    %48 = arith.addi %44, %47 : vector<16x128xi32>
    %c16_i32_18 = arith.constant 16 : i32
    %49 = vector.broadcast %c16_i32_18 : i32 to vector<16x128xi32>
    %50 = arith.shrui %48, %49 : vector<16x128xi32>
    %51 = arith.xori %48, %50 : vector<16x128xi32>
    %c2146121005_i32 = arith.constant 2146121005 : i32
    %52 = vector.broadcast %c2146121005_i32 : i32 to vector<16x128xi32>
    %53 = arith.muli %51, %52 : vector<16x128xi32>
    %c15_i32 = arith.constant 15 : i32
    %54 = vector.broadcast %c15_i32 : i32 to vector<16x128xi32>
    %55 = arith.shrui %53, %54 : vector<16x128xi32>
    %56 = arith.xori %53, %55 : vector<16x128xi32>
    %c-2073254261_i32 = arith.constant -2073254261 : i32
    %57 = vector.broadcast %c-2073254261_i32 : i32 to vector<16x128xi32>
    %58 = arith.muli %56, %57 : vector<16x128xi32>
    %c16_i32_19 = arith.constant 16 : i32
    %59 = vector.broadcast %c16_i32_19 : i32 to vector<16x128xi32>
    %60 = arith.shrui %58, %59 : vector<16x128xi32>
    %61 = arith.xori %58, %60 : vector<16x128xi32>
    %c9_i32 = arith.constant 9 : i32
    %62 = vector.broadcast %c9_i32 : i32 to vector<16x128xi32>
    %63 = arith.shrui %61, %62 : vector<16x128xi32>
    %c1065353216_i32 = arith.constant 1065353216 : i32
    %64 = vector.broadcast %c1065353216_i32 : i32 to vector<16x128xi32>
    %65 = arith.ori %63, %64 : vector<16x128xi32>
    %66 = tpu.bitcast %65 : vector<16x128xi32> -> vector<16x128xf32>
    %cst_20 = arith.constant 1.000000e+00 : f32
    %67 = vector.broadcast %cst_20 : f32 to vector<16x128xf32>
    %68 = arith.subf %66, %67 : vector<16x128xf32>
    %cst_21 = arith.constant 9.99999996E-13 : f32
    %69 = vector.broadcast %cst_21 : f32 to vector<16x128xf32>
    %70 = arith.maximumf %68, %69 : vector<16x128xf32>
    %71 = math.log %70 : vector<16x128xf32>
    %cst_22 = arith.constant 0.000000e+00 : f32
    %72 = vector.broadcast %cst_22 : f32 to vector<16x128xf32>
    %73 = arith.subf %72, %71 : vector<16x128xf32>
    %74 = arith.divf %73, %25 : vector<16x128xf32>
    %cst_23 = arith.constant 1.000000e+30 : f32
    %75 = vector.broadcast %cst_23 : f32 to vector<16x128xf32>
    %76 = arith.select %17, %74, %75 : vector<16x128xi1>, vector<16x128xf32>
    %cst_24 = arith.constant dense<0x7F800000> : vector<16xf32>
    %77 = vector.multi_reduction <minimumf>, %76, %cst_24 [1] : vector<16x128xf32> to vector<16xf32>
    %78 = vector.shape_cast %77 : vector<16xf32> to vector<16x1xf32>
    %79 = vector.broadcast %78 : vector<16x1xf32> to vector<16x128xf32>
    %80 = arith.cmpf ole, %76, %79 : vector<16x128xf32>
    %c128_i32_25 = arith.constant 128 : i32
    %81 = vector.broadcast %c128_i32_25 : i32 to vector<16x128xi32>
    %82 = arith.select %80, %15, %81 : vector<16x128xi1>, vector<16x128xi32>
    %cst_26 = arith.constant dense<2147483647> : vector<16xi32>
    %83 = vector.multi_reduction <minsi>, %82, %cst_26 [1] : vector<16x128xi32> to vector<16xi32>
    %84 = vector.shape_cast %83 : vector<16xi32> to vector<16x1xi32>
    %85 = vector.broadcast %84 : vector<16x1xi32> to vector<16x128xi32>
    %86 = arith.cmpi eq, %15, %85 : vector<16x128xi32>
    %cst_27 = arith.constant 0.000000e+00 : f32
    %87 = vector.broadcast %cst_27 : f32 to vector<16x128xf32>
    %88 = arith.select %86, %30, %87 : vector<16x128xi1>, vector<16x128xf32>
    %cst_28 = arith.constant dense<0.000000e+00> : vector<16xf32>
    %89 = vector.multi_reduction <add>, %88, %cst_28 [1] : vector<16x128xf32> to vector<16xf32>
    %90 = vector.shape_cast %89 : vector<16xf32> to vector<16x1xf32>
    %cst_29 = arith.constant 0.000000e+00 : f32
    %91 = vector.broadcast %cst_29 : f32 to vector<16x128xf32>
    %92 = arith.select %17, %30, %91 : vector<16x128xi1>, vector<16x128xf32>
    %c16_i32_30 = arith.constant 16 : i32
    %93 = vector.broadcast %c16_i32_30 : i32 to vector<16x128xi32>
    %94 = arith.cmpi eq, %15, %93 : vector<16x128xi32>
    %95 = arith.sitofp %84 : vector<16x1xi32> to vector<16x1xf32>
    %96 = vector.shape_cast %95 : vector<16x1xf32> to vector<16x1xf32>
    %97 = vector.broadcast %96 : vector<16x1xf32> to vector<16x128xf32>
    %98 = arith.select %94, %97, %92 : vector<16x128xi1>, vector<16x128xf32>
    %c17_i32 = arith.constant 17 : i32
    %99 = vector.broadcast %c17_i32 : i32 to vector<16x128xi32>
    %100 = arith.cmpi eq, %15, %99 : vector<16x128xi32>
    %101 = vector.shape_cast %90 : vector<16x1xf32> to vector<16x1xf32>
    %102 = vector.broadcast %101 : vector<16x1xf32> to vector<16x128xf32>
    %103 = arith.select %100, %102, %98 : vector<16x128xi1>, vector<16x128xf32>
    %c18_i32 = arith.constant 18 : i32
    %104 = vector.broadcast %c18_i32 : i32 to vector<16x128xi32>
    %105 = arith.cmpi eq, %15, %104 : vector<16x128xi32>
    %106 = vector.shape_cast %37 : vector<16x1xf32> to vector<16x1xf32>
    %107 = vector.broadcast %106 : vector<16x1xf32> to vector<16x128xf32>
    %108 = arith.select %105, %107, %103 : vector<16x128xi1>, vector<16x128xf32>
    %c19_i32 = arith.constant 19 : i32
    %109 = vector.broadcast %c19_i32 : i32 to vector<16x128xi32>
    %110 = arith.cmpi eq, %15, %109 : vector<16x128xi32>
    %111 = vector.shape_cast %18 : vector<16x1xf32> to vector<16x1xf32>
    %112 = vector.broadcast %111 : vector<16x1xf32> to vector<16x128xf32>
    %113 = arith.select %110, %112, %108 : vector<16x128xi1>, vector<16x128xf32>
    %c0_31 = arith.constant 0 : index
    %c0_32 = arith.constant 0 : index
    %114 = vector.load %arg7[%c0_31, %c0_32] : memref<16x128xf32, #tpu.memory_space<vmem>>, vector<16x128xf32>
    tpu.vector_store %arg7[%c0_31, %c0_32], %113 {strides = array<i32>} : memref<16x128xf32, #tpu.memory_space<vmem>>, vector<16x128xf32>,
    return
  }
  func.func @transform_0(%arg0: i32, %arg1: memref<1xi32, #tpu.memory_space<smem>>) -> (i32, i32) {
    %c0_i32 = arith.constant 0 : i32
    %c0_i32_0 = arith.constant 0 : i32
    return %arg0, %c0_i32 : i32, i32
  }
  func.func @transform_1(%arg0: i32, %arg1: memref<1xi32, #tpu.memory_space<smem>>) -> (i32, i32) {
    %c0_i32 = arith.constant 0 : i32
    %c0_i32_0 = arith.constant 0 : i32
    %c0_i32_1 = arith.constant 0 : i32
    return %c0_i32, %c0_i32_0 : i32, i32
  }
  func.func @transform_2(%arg0: i32, %arg1: memref<1xi32, #tpu.memory_space<smem>>) -> (i32, i32) {
    %c0_i32 = arith.constant 0 : i32
    %c0_i32_0 = arith.constant 0 : i32
    %c0_i32_1 = arith.constant 0 : i32
    return %c0_i32, %c0_i32_0 : i32, i32
  }
  func.func @transform_3(%arg0: i32, %arg1: memref<1xi32, #tpu.memory_space<smem>>) -> (i32, i32) {
    %c0_i32 = arith.constant 0 : i32
    %c0_i32_0 = arith.constant 0 : i32
    %c0_i32_1 = arith.constant 0 : i32
    return %c0_i32, %c0_i32_0 : i32, i32
  }
  func.func @transform_4(%arg0: i32, %arg1: memref<1xi32, #tpu.memory_space<smem>>) -> (i32, i32) {
    %c0_i32 = arith.constant 0 : i32
    %c0_i32_0 = arith.constant 0 : i32
    %c0_i32_1 = arith.constant 0 : i32
    return %c0_i32, %c0_i32_0 : i32, i32
  }
  func.func @transform_5(%arg0: i32, %arg1: memref<1xi32, #tpu.memory_space<smem>>) -> (i32, i32) {
    %c0_i32 = arith.constant 0 : i32
    %c0_i32_0 = arith.constant 0 : i32
    return %arg0, %c0_i32 : i32, i32
  }
}

</mosaic_0001>

<bundles_post_ra>
// kernel: tpu_custom_call.1
= control target key start
LH: loop header
LB: loop body
LE: loop exit
PB: predicated region body
PF: predicated region fallthrough
CT: control target
= control target key end

     0   :  { %12 = vsyncpa [#allocation5], 0  ;;  %s1696_s0 = inlined_call_operand.<no memory space> [shape: s32[1], index: 0, kind: input, shape index: {}]   ;;  %s1697_s1 = inlined_call_operand.hbm [shape: f32[16,1024], index: 1, kind: input, shape index: {}]   ;;  %s1698_s2 = inlined_call_operand.hbm [shape: bf16[1024,128], index: 2, kind: input, shape index: {}]   ;;  %s1699_s3 = inlined_call_operand.vmem [shape: f32[1,128], index: 3, kind: input, shape index: {}]   ;;  %s1700_s4 = inlined_call_operand.hbm [shape: bf16[128,128], index: 4, kind: input, shape index: {}]   ;;  %s1701_s5 = inlined_call_operand.vmem [shape: f32[1,128], index: 5, kind: input, shape index: {}]   ;;  %s1702_s6 = inlined_call_operand.hbm [shape: f32[16,128], index: 6, kind: output, shape index: {}]  }
   0x1   :  { %13 = vsyncpa [#allocation8], 0  ;;  %s32_s23 = sshll.u32 %s1698_s2, 4  ;;  %s33_s23 = int_to_ptr.hbm [resolvable:$true] %s32_s23 }
   0x2   :  { %14 = vsyncpa [#allocation6], 0  ;;  %s1542_s24 = smov [#allocation7]   ;;  %s19_s28 = sshll.u32 %s1697_s1, 4  ;;  %s20_s28 = int_to_ptr.hbm [resolvable:$true] %s19_s28 }
   0x3   :  { %s34_s25 = sshll.u32 %s1542_s24, 4  ;;  %s1543_s29 = smov 64   ;;  %s35_s25 = int_to_ptr.vmem [resolvable:$true] %s34_s25 }
   0x4   :  { %s1544_s30 = smov 4   ;;  %s1545_s7 = smov [#allocation4]  }
   0x5   :  { %40 = dma.hbm_to_vmem [thread:$0]  %s33_s23, 8192, %s35_s25, [#allocation8], %s1543_s29, %s1543_s29, %s1544_s30  }
   0x6   :  { %s21_s8 = sshll.u32 %s1545_s7, 4  ;;  %s47_s2 = sshll.u32 %s1700_s4, 4  ;;  %s22_s8 = int_to_ptr.vmem [resolvable:$true] %s21_s8  ;;  %s48_s2 = int_to_ptr.hbm [resolvable:$true] %s47_s2 }
   0x7   :  { %s1546_s11 = smov 1024   ;;  %s1547_s12 = smov [#allocation9]  }
   0x8   :  { %27 = dma.hbm_to_vmem [thread:$0]  %s20_s28, 2048, %s22_s8, [#allocation5], %s1546_s11, %s1546_s11, %s1543_s29  }
   0x9   :  { %s49_s13 = sshll.u32 %s1547_s12, 4  ;;  %s50_s13 = int_to_ptr.vmem [resolvable:$true] %s49_s13 }
   0xa   :  { %55 = dma.hbm_to_vmem [thread:$0]  %s48_s2, 1024, %s50_s13, [#allocation8], %s1543_s29, %s1543_s29, %s1544_s30  }
   0xb   :  { %1536 = dma.done.wait [#allocation5], 2048  }
   0xc   :  { %1537 = vsyncadd [#allocation5], 4294965248 }
   0xd   :  { %1538 = dma.done.wait [#allocation8], 9216  }
   0xe   :  { %1539 = vsyncadd [#allocation8], 4294958080  ;;  %v1341_v0 = vld [vmem:[#allocation7 + $0x38] sm:$0xff]  ;;  %v1340_v4 = vld [vmem:[#allocation7 + $0x30] sm:$0xff]  ;;  %s884_s16 = smul.u32 2654435769, %s1696_s0 }
   0xf   :  { %v1349_v1 = vld [vmem:[#allocation7 + $0x78] sm:$0xff]  ;;  %610 = vmatpush.bf16.msra.mxu0 %v1341_v0  ;;  %v1348_v5 = vld [vmem:[#allocation7 + $0x70] sm:$0xff]  ;;  %v1339_v8 = vld [vmem:[#allocation7 + $0x28] sm:$0xff]  ;;  %s1549_s0 = smov [#allocation10]   ;;  %s1030_s20 = sshll.u32 %s1702_s6, 4  ;;  %s1031_s20 = int_to_ptr.hbm [resolvable:$true] %s1030_s20 }
  0x10   :  { %v1357_v2 = vld [vmem:[#allocation7 + $0xb8] sm:$0xff]  ;;  %624 = vmatpush.bf16.msra.mxu1 %v1349_v1  ;;  %v1356_v6 = vld [vmem:[#allocation7 + $0xb0] sm:$0xff]  ;;  %v1347_v9 = vld [vmem:[#allocation7 + $0x68] sm:$0xff]  ;;  %s1028_s17 = sshll.u32 %s1549_s0, 4  ;;  %s1550_s21 = smov 128   ;;  %s1029_s17 = int_to_ptr.vmem [resolvable:$true] %s1028_s17 }
  0x11   :  { %v1365_v3 = vld [vmem:[#allocation7 + $0xf8] sm:$0xff]  ;;  %638 = vmatpush.bf16.msra.mxu2 %v1357_v2  ;;  %v1364_v7 = vld [vmem:[#allocation7 + $0xf0] sm:$0xff]  ;;  %v1355_v10 = vld [vmem:[#allocation7 + $0xa8] sm:$0xff]  ;;  %s1551_s22 = smov 8  }
  0x12   :  { %652 = vmatpush.bf16.msra.mxu3 %v1365_v3  ;;  %v1363_v11 = vld [vmem:[#allocation7 + $0xe8] sm:$0xff]  ;;  %v1338_v12 = vld [vmem:[#allocation7 + $0x20] sm:$0xff]  ;;  %v1337_v16 = vld [vmem:[#allocation7 + $0x18] sm:$0xff] }
  0x13   :  { %611 = vmatpush.bf16.msra.mxu0 %v1340_v4  ;;  %v1346_v13 = vld [vmem:[#allocation7 + $0x60] sm:$0xff]  ;;  %v1345_v17 = vld [vmem:[#allocation7 + $0x58] sm:$0xff]  ;;  %v1336_v20 = vld [vmem:[#allocation7 + $0x10] sm:$0xff] }
  0x14   :  { %625 = vmatpush.bf16.msra.mxu1 %v1348_v5  ;;  %v1354_v14 = vld [vmem:[#allocation7 + $0xa0] sm:$0xff]  ;;  %v1353_v18 = vld [vmem:[#allocation7 + $0x98] sm:$0xff]  ;;  %v1344_v21 = vld [vmem:[#allocation7 + $0x50] sm:$0xff] }
  0x15   :  { %639 = vmatpush.bf16.msra.mxu2 %v1356_v6  ;;  %v1362_v15 = vld [vmem:[#allocation7 + $0xe0] sm:$0xff]  ;;  %v1361_v19 = vld [vmem:[#allocation7 + $0xd8] sm:$0xff]  ;;  %v1352_v22 = vld [vmem:[#allocation7 + $0x90] sm:$0xff] }
  0x16   :  { %653 = vmatpush.bf16.msra.mxu3 %v1364_v7  ;;  %v1360_v23 = vld [vmem:[#allocation7 + $0xd0] sm:$0xff]  ;;  %v1335_v24 = vld [vmem:[#allocation7 + $0x8] sm:$0xff]  ;;  %v1334_v28 = vld [vmem:[#allocation7] sm:$0xff] }
  0x17   :  { %612 = vmatpush.bf16.msra.mxu0 %v1339_v8  ;;  %v1343_v25 = vld [vmem:[#allocation7 + $0x48] sm:$0xff]  ;;  %v1342_v29 = vld [vmem:[#allocation7 + $0x40] sm:$0xff]  ;;  %v1373_v32 = vld [vmem:[#allocation7 + $0x138] sm:$0xff] }
  0x18   :  { %626 = vmatpush.bf16.msra.mxu1 %v1347_v9  ;;  %v1351_v26 = vld [vmem:[#allocation7 + $0x88] sm:$0xff]  ;;  %v1350_v30 = vld [vmem:[#allocation7 + $0x80] sm:$0xff]  ;;  %v1381_v33 = vld [vmem:[#allocation7 + $0x178] sm:$0xff] }
  0x19   :  { %640 = vmatpush.bf16.msra.mxu2 %v1355_v10  ;;  %v1359_v27 = vld [vmem:[#allocation7 + $0xc8] sm:$0xff]  ;;  %v1358_v31 = vld [vmem:[#allocation7 + $0xc0] sm:$0xff]  ;;  %v72_v34 = vld [vmem:[#allocation4 + $0x10] sm:$0xff] }
  0x1a   :  { %654 = vmatpush.bf16.msra.mxu3 %v1363_v11  ;;  %v80_v35 = vld [vmem:[#allocation4 + $0x50] sm:$0xff]  ;;  %v70_v36 = vld [vmem:[#allocation4] sm:$0xff]  ;;  %v73_v38 = vld [vmem:[#allocation4 + $0x18] sm:$0xff] }
  0x1b   :  { %613 = vmatpush.bf16.msra.mxu0 %v1338_v12  ;;  %v78_v37 = vld [vmem:[#allocation4 + $0x40] sm:$0xff]  ;;  %v81_v39 = vld [vmem:[#allocation4 + $0x58] sm:$0xff]  ;;  %v71_v40 = vld [vmem:[#allocation4 + $0x8] sm:$0xff]  ;;  %v88_v44 = vpack.c.bf16 %v80_v35, %v72_v34 }
  0x1c   :  { %627 = vmatpush.bf16.msra.mxu1 %v1346_v13  ;;  %v79_v41 = vld [vmem:[#allocation4 + $0x48] sm:$0xff]  ;;  %v1389_v42 = vld [vmem:[#allocation7 + $0x1b8] sm:$0xff]  ;;  %v86_v45 = vpack.c.bf16 %v78_v37, %v70_v36  ;;  %v89_v46 = vpack.c.bf16 %v81_v39, %v73_v38  ;;  %v1372_v48 = vld [vmem:[#allocation7 + $0x130] sm:$0xff] }
  0x1d   :  { %641 = vmatpush.bf16.msra.mxu2 %v1354_v14  ;;  %v1397_v43 = vld [vmem:[#allocation7 + $0x1f8] sm:$0xff]  ;;  %v87_v47 = vpack.c.bf16 %v79_v41, %v71_v40  ;;  %v1380_v49 = vld [vmem:[#allocation7 + $0x170] sm:$0xff]  ;;  %v1371_v52 = vld [vmem:[#allocation7 + $0x128] sm:$0xff] }
  0x1e   :  { %655 = vmatpush.bf16.msra.mxu3 %v1362_v15  ;;  %v1388_v50 = vld [vmem:[#allocation7 + $0x1b0] sm:$0xff]  ;;  %v1379_v53 = vld [vmem:[#allocation7 + $0x168] sm:$0xff]  ;;  %v1370_v56 = vld [vmem:[#allocation7 + $0x120] sm:$0xff] }
  0x1f   :  { %614 = vmatpush.bf16.msra.mxu0 %v1337_v16  ;;  %v1396_v51 = vld [vmem:[#allocation7 + $0x1f0] sm:$0xff]  ;;  %v1387_v54 = vld [vmem:[#allocation7 + $0x1a8] sm:$0xff]  ;;  %v1378_v57 = vld [vmem:[#allocation7 + $0x160] sm:$0xff] }
  0x20   :  { %628 = vmatpush.bf16.msra.mxu1 %v1345_v17  ;;  %v1395_v55 = vld [vmem:[#allocation7 + $0x1e8] sm:$0xff]  ;;  %v1386_v58 = vld [vmem:[#allocation7 + $0x1a0] sm:$0xff]  ;;  %v1369_v60 = vld [vmem:[#allocation7 + $0x118] sm:$0xff] }
  0x21   :  { %642 = vmatpush.bf16.msra.mxu2 %v1353_v18  ;;  %v1394_v59 = vld [vmem:[#allocation7 + $0x1e0] sm:$0xff]  ;;  %v1377_v61 = vld [vmem:[#allocation7 + $0x158] sm:$0xff]  ;;  %v1368_v0 = vld [vmem:[#allocation7 + $0x110] sm:$0xff] }
  0x22   :  { %656 = vmatpush.bf16.msra.mxu3 %v1361_v19  ;;  %v1385_v62 = vld [vmem:[#allocation7 + $0x198] sm:$0xff]  ;;  %v1376_v1 = vld [vmem:[#allocation7 + $0x150] sm:$0xff]  ;;  %v1367_v4 = vld [vmem:[#allocation7 + $0x108] sm:$0xff] }
  0x23   :  { %615 = vmatpush.bf16.msra.mxu0 %v1336_v20  ;;  %v1393_v63 = vld [vmem:[#allocation7 + $0x1d8] sm:$0xff]  ;;  %v1384_v2 = vld [vmem:[#allocation7 + $0x190] sm:$0xff]  ;;  %v1375_v5 = vld [vmem:[#allocation7 + $0x148] sm:$0xff] }
  0x24   :  { %629 = vmatpush.bf16.msra.mxu1 %v1344_v21  ;;  %v1392_v3 = vld [vmem:[#allocation7 + $0x1d0] sm:$0xff]  ;;  %v1383_v6 = vld [vmem:[#allocation7 + $0x188] sm:$0xff]  ;;  %v1366_v8 = vld [vmem:[#allocation7 + $0x100] sm:$0xff] }
  0x25   :  { %643 = vmatpush.bf16.msra.mxu2 %v1352_v22  ;;  %v1391_v7 = vld [vmem:[#allocation7 + $0x1c8] sm:$0xff]  ;;  %v1374_v9 = vld [vmem:[#allocation7 + $0x140] sm:$0xff]  ;;  %v76_v16 = vld [vmem:[#allocation4 + $0x30] sm:$0xff] }
  0x26   :  { %657 = vmatpush.bf16.msra.mxu3 %v1360_v23  ;;  %v1382_v10 = vld [vmem:[#allocation7 + $0x180] sm:$0xff]  ;;  %v75_v14 = vld [vmem:[#allocation4 + $0x28] sm:$0xff]  ;;  %v84_v17 = vld [vmem:[#allocation4 + $0x70] sm:$0xff] }
  0x27   :  { %616 = vmatpush.bf16.msra.mxu0 %v1335_v24  ;;  %v1390_v11 = vld [vmem:[#allocation7 + $0x1c0] sm:$0xff]  ;;  %v83_v15 = vld [vmem:[#allocation4 + $0x68] sm:$0xff]  ;;  %v77_v18 = vld [vmem:[#allocation4 + $0x38] sm:$0xff]  ;;  %v92_v22 = vpack.c.bf16 %v84_v17, %v76_v16  ;;  %v885_v16 = vstv %s884_s16 }
  0x28   :  { %630 = vmatpush.bf16.msra.mxu1 %v1343_v25  ;;  %v74_v12 = vld [vmem:[#allocation4 + $0x20] sm:$0xff]  ;;  %v85_v19 = vld [vmem:[#allocation4 + $0x78] sm:$0xff]  ;;  %v91_v21 = vpack.c.bf16 %v83_v15, %v75_v14  ;;  %v1404_v25 = vld [vmem:[#allocation9 + $0x30] sm:$0xff] }
  0x29   :  { %644 = vmatpush.bf16.msra.mxu2 %v1351_v26  ;;  %v82_v13 = vld [vmem:[#allocation4 + $0x60] sm:$0xff]  ;;  %v93_v23 = vpack.c.bf16 %v85_v19, %v77_v18  ;;  %v1405_v24 = vld [vmem:[#allocation9 + $0x38] sm:$0xff]  ;;  %v1403_v26 = vld [vmem:[#allocation9 + $0x28] sm:$0xff] }
  0x2a   :  { %658 = vmatpush.bf16.msra.mxu3 %v1359_v27  ;;  %v90_v20 = vpack.c.bf16 %v82_v13, %v74_v12  ;;  %v1402_v27 = vld [vmem:[#allocation9 + $0x20] sm:$0xff] }
  0x2b   :  { %617 = vmatpush.bf16.msra.mxu0 %v1334_v28  ;;  %v1401_v28 = vld [vmem:[#allocation9 + $0x18] sm:$0xff]  ;;  %v1418_v34 = vld [vmem:[%s1699_s3] ss:$0 sm:$0xff] }
  0x2c   :  { %631 = vmatpush.bf16.msra.mxu1 %v1342_v29  ;;  %v1400_v29 = vld [vmem:[#allocation9 + $0x10] sm:$0xff] }
  0x2d   :  { %645 = vmatpush.bf16.msra.mxu2 %v1350_v30 }
  0x2e   :  { %659 = vmatpush.bf16.msra.mxu3 %v1358_v31  ;;  %618 = vmatmul.bf16.vlgmr.msra.gmra.mxu0 %v86_v45  ;;  %v1399_v31 = vld [vmem:[#allocation9 + $0x8] sm:$0xff] }
  0x2f   :  { %666 = vmatpush.bf16.msrb.mxu0 %v1373_v32  ;;  %632 = vmatmul.bf16.vlgmr.msra.gmra.mxu1 %v87_v47 }
  0x30   :  { %680 = vmatpush.bf16.msrb.mxu1 %v1381_v33  ;;  %646 = vmatmul.bf16.vlgmr.msra.gmra.mxu2 %v88_v44  ;;  %v1398_v33 = vld [vmem:[#allocation9] sm:$0xff] }
  0x31   :  { %694 = vmatpush.bf16.msrb.mxu2 %v1389_v42  ;;  %660 = vmatmul.bf16.vlgmr.msra.gmra.mxu3 %v89_v46 }
  0x32   :  { %708 = vmatpush.bf16.msrb.mxu3 %v1397_v43 }
  0x33   :  { %667 = vmatpush.bf16.msrb.mxu0 %v1372_v48 }
  0x34   :  { %681 = vmatpush.bf16.msrb.mxu1 %v1380_v49 }
  0x35   :  { %695 = vmatpush.bf16.msrb.mxu2 %v1388_v50 }
  0x36   :  { %709 = vmatpush.bf16.msrb.mxu3 %v1396_v51 }
  0x37   :  { %668 = vmatpush.bf16.msrb.mxu0 %v1371_v52 }
  0x38   :  { %682 = vmatpush.bf16.msrb.mxu1 %v1379_v53 }
  0x39   :  { %696 = vmatpush.bf16.msrb.mxu2 %v1387_v54 }
  0x3a   :  { %710 = vmatpush.bf16.msrb.mxu3 %v1395_v55 }
  0x3b   :  { %669 = vmatpush.bf16.msrb.mxu0 %v1370_v56 }
  0x3c   :  { %683 = vmatpush.bf16.msrb.mxu1 %v1378_v57 }
  0x3d   :  { %697 = vmatpush.bf16.msrb.mxu2 %v1386_v58 }
  0x3e   :  { %711 = vmatpush.bf16.msrb.mxu3 %v1394_v59 }
  0x3f   :  { %670 = vmatpush.bf16.msrb.mxu0 %v1369_v60 }
  0x40   :  { %684 = vmatpush.bf16.msrb.mxu1 %v1377_v61 }
  0x41   :  { %698 = vmatpush.bf16.msrb.mxu2 %v1385_v62 }
  0x42   :  { %712 = vmatpush.bf16.msrb.mxu3 %v1393_v63 }
  0x43   :  { %671 = vmatpush.bf16.msrb.mxu0 %v1368_v0 }
  0x44   :  { %685 = vmatpush.bf16.msrb.mxu1 %v1376_v1 }
  0x45   :  { %699 = vmatpush.bf16.msrb.mxu2 %v1384_v2 }
  0x46   :  { %713 = vmatpush.bf16.msrb.mxu3 %v1392_v3 }
  0x47   :  { %672 = vmatpush.bf16.msrb.mxu0 %v1367_v4  ;;  %v807_v4 = vlaneseq }
  0x48   :  { %686 = vmatpush.bf16.msrb.mxu1 %v1375_v5 }
  0x49   :  { %700 = vmatpush.bf16.msrb.mxu2 %v1383_v6  ;;  %v1599_v5 = vand.u32 127, %v807_v4  ;;  %v1419_v6 = vld [vmem:[%s1701_s5] ss:$0 sm:$0xff]  ;;  %v873_v13 = vshrl.u32 %v807_v4, 7 }
  0x4a   :  { %714 = vmatpush.bf16.msrb.mxu3 %v1391_v7 }
  0x4b   :  { %673 = vmatpush.bf16.msrb.mxu0 %v1366_v8  ;;  %vm809_vm0 = vcmp.lt.s32.totalorder %v1599_v5, 16  ;;  %v879_v14 = vmul.u32 128, %v873_v13  ;;  %v874_v18 = vadd.s32 8, %v873_v13 }
  0x4c   :  { %687 = vmatpush.bf16.msrb.mxu1 %v1374_v9 }
  0x4d   :  { %701 = vmatpush.bf16.msrb.mxu2 %v1382_v10  ;;  %v881_v15 = vadd.s32 %v879_v14, %v1599_v5 }
  0x4e   :  { %715 = vmatpush.bf16.msrb.mxu3 %v1390_v11  ;;  %674 = vmatmul.bf16.vlgmr.msrb.gmra.mxu0 %v90_v20  ;;  %v880_v20 = vmul.u32 128, %v874_v18 }
  0x4f   :  { %688 = vmatmul.bf16.vlgmr.msrb.gmra.mxu1 %v91_v21  ;;  %793 = vmatpush.bf16.msra.mxu0 %v1405_v24  ;;  %v886_v17 = vadd.s32 %v885_v16, %v881_v15 }
  0x50   :  { %702 = vmatmul.bf16.vlgmr.msrb.gmra.mxu2 %v92_v22  ;;  %v882_v21 = vadd.s32 %v880_v20, %v1599_v5 }
  0x51   :  { %716 = vmatmul.bf16.vlgmr.msrb.gmra.mxu3 %v93_v23  ;;  %v888_v19 = vshrl.u32 %v886_v17, 16 }
  0x52   :  { %v887_v23 = vadd.s32 %v885_v16, %v882_v21 }
  0x53   :  { %794 = vmatpush.bf16.msra.mxu0 %v1404_v25  ;;  %v890_v22 = vxor.u32 %v888_v19, %v886_v17 }
  0x54   :  { %v889_v25 = vshrl.u32 %v887_v23, 16 }
  0x55   :  { %v892_v24 = vmul.u32 2146121005, %v890_v22 }
  0x57   :  { %795 = vmatpush.bf16.msra.mxu0 %v1403_v26  ;;  %v894_v26 = vshrl.u32 %v892_v24, 15 }
  0x5b   :  { %796 = vmatpush.bf16.msra.mxu0 %v1402_v27  ;;  %v891_v27 = vxor.u32 %v889_v25, %v887_v23 }
  0x5f   :  { %797 = vmatpush.bf16.msra.mxu0 %v1401_v28  ;;  %v896_v28 = vxor.u32 %v894_v26, %v892_v24 }
  0x63   :  { %798 = vmatpush.bf16.msra.mxu0 %v1400_v29  ;;  %v893_v29 = vmul.u32 2146121005, %v891_v27 }
  0x67   :  { %799 = vmatpush.bf16.msra.mxu0 %v1399_v31  ;;  %v895_v31 = vshrl.u32 %v893_v29, 15 }
  0x6b   :  { %800 = vmatpush.bf16.msra.mxu0 %v1398_v33  ;;  %v897_v33 = vxor.u32 %v895_v31, %v893_v29 }
  0xab   :  { %v619_v30 = vpop.f32.mrf.mxu0 }
  0xac   :  { %v633_v32 = vpop.f32.mrf.mxu1  ;;  %v620_v37 = vadd.f32 %v1418_v34, %v619_v30  ;;  %v898_v30 = vmul.u32 2221713035, %v896_v28 }
  0xae   :  { %v634_v40 = vadd.f32 %v633_v32, %v620_v37  ;;  %v900_v32 = vshrl.u32 %v898_v30, 16 }
  0xb3   :  { %v647_v35 = vpop.f32.mrf.mxu2  ;;  %v621_v38 = vpop.f32.mrf.mxu0 }
  0xb4   :  { %v661_v36 = vpop.f32.mrf.mxu3  ;;  %v635_v39 = vpop.f32.mrf.mxu1  ;;  %v622_v41 = vadd.f32 %v1418_v34, %v621_v38  ;;  %v648_v44 = vadd.f32 %v647_v35, %v634_v40  ;;  %v902_v34 = vxor.u32 %v900_v32, %v898_v30  ;;  %v899_v35 = vmul.u32 2221713035, %v897_v33 }
  0xb5   :  { %v1548_v33 = vmov 16  }
  0xb6   :  { %v636_v45 = vadd.f32 %v635_v39, %v622_v41  ;;  %v662_v48 = vadd.f32 %v661_v36, %v648_v44  ;;  %v904_v36 = vshrl.u32 %v902_v34, 9  ;;  %v901_v37 = vshrl.u32 %v899_v35, 16  ;;  %1416 = vset.pattern.permute.xlu2 %v1548_v33  ;;  %1417 = vset.pattern.permute.xlu0 %v1548_v33 }
  0xb8   :  { %v906_v38 = vor.u32 1065353216, %v904_v36  ;;  %v903_v39 = vxor.u32 %v901_v37, %v899_v35 }
  0xba   :  { %v905_v44 = vshrl.u32 %v903_v39, 9 }
  0xbb   :  { %v649_v42 = vpop.f32.mrf.mxu2 }
  0xbc   :  { %v663_v43 = vpop.f32.mrf.mxu3  ;;  %v650_v49 = vadd.f32 %v649_v42, %v636_v45 }
  0xbe   :  { %v664_v53 = vadd.f32 %v663_v43, %v650_v49  ;;  %v1332_v43 = vadd.f32 -1.0, %v906_v38 }
  0xc0   :  { %v912_v45 = vmax.f32 %v1332_v43, 1e-12 }
  0xcb   :  { %v675_v46 = vpop.f32.mrf.mxu0 }
  0xcc   :  { %v689_v47 = vpop.f32.mrf.mxu1  ;;  %v676_v50 = vadd.f32 %v675_v46, %v662_v48  ;;  %v907_v46 = vor.u32 1065353216, %v905_v44 }
  0xce   :  { %v690_v55 = vadd.f32 %v689_v47, %v676_v50 }
  0xd3   :  { %v703_v51 = vpop.f32.mrf.mxu2  ;;  %v677_v54 = vpop.f32.mrf.mxu0 }
  0xd4   :  { %v717_v52 = vpop.f32.mrf.mxu3  ;;  %v678_v56 = vadd.f32 %v677_v54, %v664_v53  ;;  %v704_v57 = vadd.f32 %v703_v51, %v690_v55  ;;  %v691_v58 = vpop.f32.mrf.mxu1  ;;  %v1333_v51 = vadd.f32 -1.0, %v907_v46 }
  0xd6   :  { %v692_v59 = vadd.f32 %v691_v58, %v678_v56  ;;  %v718_v61 = vadd.f32 %v717_v52, %v704_v57  ;;  %v913_v52 = vmax.f32 %v1333_v51, 1e-12 }
  0xd8   :  { %v722_v1 = vmax.f32 %v718_v61, 0.0 }
  0xdb   :  { %v705_v60 = vpop.f32.mrf.mxu2 }
  0xdc   :  { %v706_v62 = vadd.f32 %v705_v60, %v692_v59  ;;  %v719_v63 = vpop.f32.mrf.mxu3 }
  0xde   :  { %v720_v0 = vadd.f32 %v719_v63, %v706_v62 }
  0xe0   :  { %v723_v2 = vmax.f32 %v720_v0, 0.0 }
  0xe2   :  { %v724_v3 = vpack.c.bf16 %v723_v2, %v722_v1 }
  0xe4   :  { %801 = vmatmul.bf16.vlgmr.msra.gmra.mxu0 %v724_v3 }
 0x161   :  { %v802_v7 = vpop.f32.mrf.mxu0 }
 0x162   :  { %v1605_v8 = vadd.f32 %v1419_v6, %v802_v7 }
 0x164   :  { %v810_v9 = vsel %vm809_vm0, %v1605_v8, -1e+30 }
 0x165   :  { %812 = vmax.xlane.f32.xlu0 %v810_v9 }
 0x169   :  { %v804_v10 = vpop.f32.mrf.mxu0 }
 0x16a   :  { %v1610_v11 = vadd.f32 %v1419_v6, %v804_v10 }
 0x16c   :  { %v811_v12 = vsel %vm809_vm0, %v1610_v11, -1e+30 }
 0x16d   :  { %814 = vmax.xlane.f32.xlu0 %v811_v12 }
 0x1d8   :  { %v813_v40 = vpop.xlane.xlu0 %812 }
 0x1d9   :  { %v1620_v41 = vsub.f32 %v810_v9, %v813_v40 }
 0x1db   :  { %v818_v42 = vmul.f32 1.442695, %v1620_v41 }
 0x1dd   :  { %1420 = vpow2.f32 %v818_v42 }
 0x1de   :  { %1422 = vlog2.f32 %v912_v45 }
 0x1e0   :  { %v815_v47 = vpop.xlane.xlu0 %814 }
 0x1e1   :  { %v1623_v48 = vsub.f32 %v811_v12, %v815_v47 }
 0x1e3   :  { %v1421_v49 = vpop.eup %1420  ;;  %v820_v50 = vmul.f32 1.442695, %v1623_v48 }
 0x1e4   :  { %822 = vadd.xlane.f32.xlu0 %v1421_v49  ;;  %1424 = vrcp.f32 %v1421_v49  ;;  %v1423_v53 = vpop.eup %1422  ;;  %v931_v59 = vand.u32 2147483648, %v1421_v49  ;;  %v929_v61 = vand.u32 2147483647, %v1421_v49  ;;  %vm925_vm2 = vweird.f32 %v1421_v49 }
 0x1e5   :  { %1426 = vpow2.f32 %v820_v50  ;;  %v915_v57 = vmul.f32 0.6931472, %v1423_v53  ;;  %v832_v23 = vmul.f32 %v1421_v49, %v1620_v41 }
 0x1e6   :  { %1428 = vlog2.f32 %v913_v52  ;;  %v932_v2 = vor.u32 1.1754944e-38, %v931_v59  ;;  %vm930_vm4 = vcmp.eq.f32.partialorder %v929_v61, 8.507059e+37 }
 0x1e7   :  { %v918_v63 = vsub.f32 0.0, %v915_v57  ;;  %v834_v24 = vsel %vm809_vm0, %v832_v23, 0.0 }
 0x1ea   :  { %v1425_v54 = vpop.eup %1424 }
 0x1eb   :  { %v1626_v55 = vpop.eup %1426  ;;  %v921_v56 = vmul.f32 %v1425_v54, %v1421_v49  ;;  %vm926_vm1 = vweird.f32 %v1425_v54 }
 0x1ec   :  { %1430 = vrcp.f32 %v1626_v55  ;;  %v1429_v62 = vpop.eup %1428  ;;  %vm927_vm3 = vmor %vm925_vm2, %vm926_vm1  ;;  %v946_v12 = vand.u32 2147483648, %v1626_v55  ;;  %v944_v15 = vand.u32 2147483647, %v1626_v55  ;;  %vm940_vm6 = vweird.f32 %v1626_v55 }
 0x1ed   :  { %v922_v58 = vsub.f32 1.0, %v921_v56  ;;  %v917_v9 = vmul.f32 0.6931472, %v1429_v62  ;;  %v833_v39 = vmul.f32 %v1626_v55, %v1623_v48 }
 0x1ee   :  { %v947_v18 = vor.u32 1.1754944e-38, %v946_v12  ;;  %vm945_vm8 = vcmp.eq.f32.partialorder %v944_v15, 8.507059e+37 }
 0x1ef   :  { %v923_v60 = vmul.f32 %v1425_v54, %v922_v58  ;;  %v919_v16 = vsub.f32 0.0, %v917_v9  ;;  %v835_v44 = vsel %vm809_vm0, %v833_v39, 0.0 }
 0x1f1   :  { %v924_v0 = vadd.f32 %v1425_v54, %v923_v60 }
 0x1f2   :  { %v1431_v1 = vpop.eup %1430 }
 0x1f3   :  { %v928_v3 = vsel %vm927_vm3, %v1425_v54, %v924_v0  ;;  %v936_v4 = vmul.f32 %v1431_v1, %v1626_v55  ;;  %vm941_vm5 = vweird.f32 %v1431_v1 }
 0x1f4   :  { %v933_v6 = vsel %vm930_vm4, %v932_v2, %v928_v3  ;;  %vm942_vm7 = vmor %vm940_vm6, %vm941_vm5  ;;  %vm998_vm5 = vcmp.eq.s32.totalorder %v1599_v5, 16 }
 0x1f5   :  { %v934_v7 = vmul.f32 %v933_v6, %v918_v63  ;;  %v937_v10 = vsub.f32 1.0, %v936_v4 }
 0x1f7   :  { %v950_v13 = vsel %vm809_vm0, %v934_v7, 1e+30  ;;  %v938_v14 = vmul.f32 %v1431_v1, %v937_v10 }
 0x1f8   :  { %952 = vmin.xlane.f32.xlu1 %v950_v13 }
 0x1f9   :  { %v939_v17 = vadd.f32 %v1431_v1, %v938_v14 }
 0x1fb   :  { %v943_v19 = vsel %vm942_vm7, %v1431_v1, %v939_v17  ;;  %vm1003_vm7 = vcmp.eq.s32.totalorder %v1599_v5, 17 }
 0x1fc   :  { %v948_v20 = vsel %vm945_vm8, %v947_v18, %v943_v19 }
 0x1fd   :  { %v949_v21 = vmul.f32 %v948_v20, %v919_v16 }
 0x1ff   :  { %v951_v22 = vsel %vm809_vm0, %v949_v21, 1e+30 }
 0x200   :  { %954 = vmin.xlane.f32.xlu1 %v951_v22 }
 0x208   :  { %824 = vadd.xlane.f32.xlu1 %v1626_v55 }
 0x210   :  { %836 = vadd.xlane.f32.xlu1 %v834_v24 }
 0x257   :  { %v823_v45 = vpop.xlane.xlu0 %822 }
 0x258   :  { %1432 = vlog2.f32 %v823_v45  ;;  %vm845_vm1 = vweird.f32 %v823_v45  ;;  %v849_v10 = vand.u32 2147483647, %v823_v45 }
 0x25a   :  { %vm850_vm3 = vcmp.eq.f32.partialorder %v849_v10, 8.507059e+37 }
 0x25e   :  { %v1433_v47 = vpop.eup %1432 }
 0x25f   :  { %v1651_v50 = vmul.f32 0.6931472, %v1433_v47 }
 0x261   :  { %v830_v55 = vsub.f32 %v1620_v41, %v1651_v50 }
 0x26b   :  { %v953_v25 = vpop.xlane.xlu1 %952 }
 0x26c   :  { %vm956_vm9 = vcmp.le.f32.partialorder %v950_v13, %v953_v25 }
 0x26d   :  { %v958_v26 = vsel %vm956_vm9, %v1599_v5, 128  ;;  %vm1006_vm9 = vcmp.eq.s32.totalorder %v1599_v5, 18 }
 0x26e   :  { %v961_v27 = vshra.s32 %v958_v26, 16  ;;  %v960_v34 = vand.u32 65535, %v958_v26 }
 0x270   :  { %v963_v28 = vcvt.s32.f32 %v961_v27  ;;  %v962_v36 = vcvt.s32.f32 %v960_v34 }
 0x272   :  { %964 = vmin.xlane.f32.xlu2 %v963_v28 }
 0x273   :  { %v955_v29 = vpop.xlane.xlu1 %954 }
 0x274   :  { %vm957_vm10 = vcmp.le.f32.partialorder %v951_v22, %v955_v29  ;;  %v996_v22 = vsel %vm809_vm0, %v830_v55, 0.0 }
 0x275   :  { %v959_v30 = vsel %vm957_vm10, %v1599_v5, 128  ;;  %vm1009_vm10 = vcmp.eq.s32.totalorder %v1599_v5, 19 }
 0x276   :  { %v975_v31 = vshra.s32 %v959_v30, 16  ;;  %v974_v38 = vand.u32 65535, %v959_v30 }
 0x278   :  { %v977_v32 = vcvt.s32.f32 %v975_v31  ;;  %v976_v42 = vcvt.s32.f32 %v974_v38 }
 0x27a   :  { %978 = vmin.xlane.f32.xlu2 %v977_v32 }
 0x27b   :  { %v1648_v46 = vpop.xlane.xlu1 %824 }
 0x27c   :  { %1434 = vlog2.f32 %v1648_v46  ;;  %v866_v20 = vand.u32 2147483648, %v1648_v46  ;;  %vm860_vm6 = vweird.f32 %v1648_v46  ;;  %v864_v21 = vand.u32 2147483647, %v1648_v46 }
 0x27d   :  { %1436 = vrcp.f32 %v823_v45 }
 0x27e   :  { %1438 = vrcp.f32 %v1648_v46  ;;  %v867_v27 = vor.u32 1.1754944e-38, %v866_v20 }
 0x282   :  { %v1435_v56 = vpop.eup %1434 }
 0x283   :  { %v1656_v58 = vmul.f32 0.6931472, %v1435_v56  ;;  %v1437_v41 = vpop.eup %1436  ;;  %v837_v14 = vpop.xlane.xlu1 %836 }
 0x284   :  { %v841_v1 = vmul.f32 %v1437_v41, %v823_v45  ;;  %v1439_v3 = vpop.eup %1438  ;;  %vm846_vm15 = vweird.f32 %v1437_v41 }
 0x285   :  { %v831_v63 = vsub.f32 %v1623_v48, %v1656_v58  ;;  %v856_v4 = vmul.f32 %v1439_v3, %v1648_v46  ;;  %v851_v48 = vand.u32 2147483648, %v823_v45  ;;  %vm847_vm2 = vmor %vm845_vm1, %vm846_vm15  ;;  %vm861_vm4 = vweird.f32 %v1439_v3 }
 0x286   :  { %v842_v2 = vsub.f32 1.0, %v841_v1  ;;  %vm862_vm8 = vmor %vm860_vm6, %vm861_vm4 }
 0x287   :  { %v857_v9 = vsub.f32 1.0, %v856_v4  ;;  %v852_v15 = vor.u32 1.1754944e-38, %v851_v48 }
 0x288   :  { %v843_v6 = vmul.f32 %v1437_v41, %v842_v2 }
 0x289   :  { %v858_v13 = vmul.f32 %v1439_v3, %v857_v9 }
 0x28a   :  { %v844_v7 = vadd.f32 %v1437_v41, %v843_v6 }
 0x28b   :  { %v859_v19 = vadd.f32 %v1439_v3, %v858_v13 }
 0x28c   :  { %v848_v12 = vsel %vm847_vm2, %v1437_v41, %v844_v7 }
 0x28d   :  { %v853_v16 = vsel %vm850_vm3, %v852_v15, %v848_v12  ;;  %v863_v24 = vsel %vm862_vm8, %v1439_v3, %v859_v19 }
 0x28e   :  { %v854_v17 = vmul.f32 %v853_v16, %v837_v14 }
 0x290   :  { %v870_v23 = vsub.f32 %v1651_v50, %v854_v17 }
 0x2e5   :  { %v965_v35 = vpop.xlane.xlu2 %964 }
 0x2e6   :  { %vm966_vm11 = vcmp.eq.f32.partialorder %v963_v28, %v965_v35  ;;  %v971_v49 = vcvt.f32.s32 %v965_v35  ;;  %v997_v35 = vsel %vm809_vm0, %v831_v63, 0.0 }
 0x2e7   :  { %v967_v37 = vsel %vm966_vm11, %v962_v36, inf  ;;  %vm865_vm11 = vcmp.eq.f32.partialorder %v864_v21, 8.507059e+37 }
 0x2e8   :  { %968 = vmin.xlane.f32.xlu2 %v967_v37  ;;  %v972_v52 = vshll.u32 %v971_v49, 16  ;;  %v868_v31 = vsel %vm865_vm11, %v867_v27, %v863_v24 }
 0x2ed   :  { %v979_v40 = vpop.xlane.xlu2 %978 }
 0x2ee   :  { %vm980_vm12 = vcmp.eq.f32.partialorder %v977_v32, %v979_v40  ;;  %v985_v57 = vcvt.f32.s32 %v979_v40 }
 0x2ef   :  { %v981_v43 = vsel %vm980_vm12, %v976_v42, inf }
 0x2f0   :  { %982 = vmin.xlane.f32.xlu0 %v981_v43  ;;  %838 = vadd.xlane.f32.xlu2 %v835_v44  ;;  %v986_v60 = vshll.u32 %v985_v57, 16 }
 0x308   :  { %1012 = vperm.xlu2 %1416, %v1605_v8  }
 0x35b   :  { %v969_v51 = vpop.xlane.xlu2 %968 }
 0x35c   :  { %v970_v53 = vcvt.f32.s32 %v969_v51 }
 0x35e   :  { %v973_v54 = vadd.s32 %v972_v52, %v970_v53 }
 0x360   :  { %vm988_vm13 = vcmp.eq.s32.totalorder %v1599_v5, %v973_v54  ;;  %v999_v18 = vcvt.s32.f32 %v973_v54 }
 0x361   :  { %v990_v8 = vsel %vm988_vm13, %v830_v55, 0.0 }
 0x362   :  { %992 = vadd.xlane.f32.xlu0 %v990_v8  ;;  %v1001_v25 = vsel %vm998_vm5, %v999_v18, %v996_v22 }
 0x363   :  { %v983_v59 = vpop.xlane.xlu0 %982 }
 0x364   :  { %v984_v61 = vcvt.f32.s32 %v983_v59 }
 0x366   :  { %v987_v62 = vadd.s32 %v986_v60, %v984_v61 }
 0x368   :  { %vm989_vm14 = vcmp.eq.s32.totalorder %v1599_v5, %v987_v62  ;;  %v1000_v34 = vcvt.s32.f32 %v987_v62 }
 0x369   :  { %v991_v0 = vsel %vm989_vm14, %v831_v63, 0.0 }
 0x36a   :  { %994 = vadd.xlane.f32.xlu1 %v991_v0  ;;  %v1002_v37 = vsel %vm998_vm5, %v1000_v34, %v997_v35 }
 0x376   :  { %1017 = vperm.xlu0 %1417, %v1610_v11   ;;  %v839_v11 = vpop.xlane.xlu2 %838 }
 0x377   :  { %v869_v33 = vmul.f32 %v868_v31, %v839_v11 }
 0x379   :  { %v871_v36 = vsub.f32 %v1656_v58, %v869_v33 }
 0x37e   :  { %v1013_v29 = vpop.permute.xlu2 %1012 }
 0x3d5   :  { %v993_v26 = vpop.xlane.xlu0 %992 }
 0x3d6   :  { %v1004_v28 = vsel %vm1003_vm7, %v993_v26, %v1001_v25 }
 0x3d7   :  { %v1007_v30 = vsel %vm1006_vm9, %v870_v23, %v1004_v28 }
 0x3d8   :  { %v1020_v32 = vsel %vm1009_vm10, %v1013_v29, %v1007_v30 }
 0x3d9   :  { %1022 = vst [vmem:[#allocation10] sm:$0xff] %v1020_v32 }
 0x3dd   :  { %v995_v38 = vpop.xlane.xlu1 %994 }
 0x3de   :  { %v1005_v39 = vsel %vm1003_vm7, %v995_v38, %v1002_v37 }
 0x3df   :  { %v1008_v40 = vsel %vm1006_vm9, %v871_v36, %v1005_v39 }
 0x3e8   :  { %v1018_v42 = vpop.permute.xlu0 %1017 }
 0x3e9   :  { %v1021_v43 = vsel %vm1009_vm10, %v1018_v42, %v1008_v40 }
 0x3ea   :  { %1023 = vst [vmem:[#allocation10 + $0x8] sm:$0xff] %v1021_v43 }
 0x3eb   :  { %1036 = dma.vmem_to_hbm [thread:$0]  %s1029_s17, 256, %s1031_s20, [#allocation6], %s1550_s21, %s1550_s21, %s1551_s22  }
 0x3ec   :  { %1540 = dma.done.wait [#allocation6], 256  }
 0x3ed   :  { %1541 = vsyncadd [#allocation6], 4294967040 }
 0x3ee   :  { %1041 = vsyncpa [#allocation5], 1 }
 0x3ef   :  { %1042 = vsyncpa [#allocation8], 1 }
 0x3f0   :  { %1043 = vsyncpa [#allocation6], 1 }

</bundles_post_ra>
